<compile_context>
chip_gen: v7x
topology: tpu7x:2x2x1
jax: 0.10.0
libtpu: 0.0.40
codegen_flags: <defaults>
</compile_context>

<pallas_src>
import functools

import numpy as np
import jax
import jax.numpy as jnp
from jax.experimental import pallas as pl
from jax.experimental.pallas import tpu as pltpu


_MIN_GRID_STEPS = 8           # >= 2x v7x TensorCores and enough steps for DMA overlap
_SMALL_IMAGE_BYTES = 1 << 20  # below this much HBM traffic, plain jnp.pad wins


def _cdiv(a: int, b: int) -> int:
    return -(-a // b)


def _sublane_align(dtype) -> int:
    # Sublane packing: f32 -> 8, bf16 -> 16, int8/uint8 -> 32.
    itemsize = jnp.dtype(dtype).itemsize
    return 8 * max(1, 4 // itemsize)


def _tpu_budget_and_limit():
    """Generation-aware per-step (in tile + out tile) byte budget and vmem limit."""
    kind = ""
    try:
        kind = jax.devices()[0].device_kind.lower()
    except Exception:
        pass
    if "v7" in kind:   # 64 MiB physical VMEM, 3.2 TB/s HBM: big steps but hard cap.
        return 10 << 20, 40 << 20
    if "v6" in kind:   # 128 MiB physical VMEM; raise the 32 MiB default scoped limit.
        return 14 << 20, 64 << 20
    if "v5" in kind:   # v5e: 16 MiB default scoped limit; raise it a bit.
        return 6 << 20, 32 << 20
    return 6 << 20, None


def _choose_row_tile(rows: int, per_row_bytes: int, align: int, budget: int) -> int:
    """Row tile (multiple of `align`, or the full extent) for the h>w branch."""
    if rows <= align:
        return rows
    budget_tile = max(align, (budget // max(per_row_bytes, 1)) // align * align)
    # Keep >= _MIN_GRID_STEPS grid steps so the read of tile i+1 overlaps the
    # writeback of tile i even when the whole image would fit the budget.
    steps_tile = max(align, _cdiv(_cdiv(rows, _MIN_GRID_STEPS), align) * align)
    return int(min(rows, budget_tile, steps_tile))


def _choose_col_tile(w: int, c: int, per_col_bytes: int, budget: int):
    """128-aligned column tile + tile count for the h<w branch (grid = c * n_tiles)."""
    max_nt = _cdiv(w, 128)
    if max_nt <= 1:
        return w, 1
    nt_budget = _cdiv(w * per_col_bytes, budget)   # tiles forced by the VMEM budget
    nt_steps = _cdiv(_MIN_GRID_STEPS, c)           # tiles needed so c*n_tiles >= min grid
    nt0 = min(max(nt_budget, nt_steps, 1), max_nt)
    best = None
    for nt in range(nt0, min(nt0 + 3, max_nt) + 1):
        tile_w = w if nt <= 1 else min(w, max(128, _cdiv(_cdiv(w, nt), 128) * 128))
        n_act = _cdiv(w, tile_w)
        grid = c * n_act
        key = (
            0 if (grid % 2 == 0 or grid >= 2 * _MIN_GRID_STEPS) else 1,  # even grid (v7x megacore)
            0 if grid >= _MIN_GRID_STEPS else 1,                         # enough steps to pipeline
            n_act,                                                       # then prefer biggest tiles
        )
        if best is None or key < best[0]:
            best = (key, tile_w, n_act)
    return best[1], best[2]


def _pad_concat_kernel(x_ref, o_ref, *, pad, axis, fill):
    # Build the whole output tile in-register, store it exactly once (dense store).
    x = x_ref[...]
    band_shape = list(x.shape)
    band_shape[axis] = pad
    band = jnp.full(tuple(band_shape), fill, dtype=x.dtype)
    o_ref[...] = jnp.concatenate([band, x, band], axis=axis)


def _reference_pad_to_square(image, fill=0):
    c, h, w = image.shape
    if h == w:
        return image
    if h > w:
        p = (h - w) // 2
        return jnp.pad(image, ((0, 0), (0, 0), (p, p)), constant_values=fill)
    p = (w - h) // 2
    return jnp.pad(image, ((0, 0), (p, p), (0, 0)), constant_values=fill)


def pad_to_square(image: jax.Array, fill=0, padding_mode: str = "constant",
                  *, force_pallas: bool = False) -> jax.Array:
    """JAX/Pallas equivalent of PadToSquare.forward for a CHW image."""
    if padding_mode != "constant":
        # TODO(synk): only 'constant' padding_mode (the module default) is implemented.
        raise NotImplementedError("only constant padding_mode is supported")

    c, h, w = image.shape
    if h == w:
        return image

    if h > w:
        padding = (h - w) // 2
        pad_h, pad_w = 0, padding
        out_minor = w + 2 * padding
    else:
        padding = (w - h) // 2
        pad_h, pad_w = padding, 0
        out_minor = w
    if padding == 0:  # |h - w| == 1: torch pads by 0 on each side -> unchanged.
        return image

    # Resolve the fill to a Python scalar so it can be baked into the kernel.
    static_fill = fill
    if not isinstance(static_fill, (bool, int, float)):
        try:
            static_fill = np.asarray(static_fill).item()
        except Exception:
            static_fill = None  # traced fill -> jnp.pad fallback below

    itemsize = jnp.dtype(image.dtype).itemsize
    out_elems = c * (h + 2 * pad_h) * (w + 2 * pad_w)
    traffic_bytes = (c * h * w + out_elems) * itemsize
    use_pallas = force_pallas or (traffic_bytes >= _SMALL_IMAGE_BYTES and out_minor >= 128)
    if static_fill is None or not use_pallas:
        # Small images (launch + per-step overhead dominates, and a <128 minor
        # dim would force masked stores) and traced fill values use XLA's pad.
        # TODO(synk): dynamic (traced) fill would need an SMEM scalar input.
        return jnp.pad(image, ((0, 0), (pad_h, pad_h), (pad_w, pad_w)), constant_values=fill)

    budget, vmem_limit = _tpu_budget_and_limit()
    cp_kwargs = dict(dimension_semantics=("parallel",))
    if vmem_limit is not None:
        cp_kwargs["vmem_limit_bytes"] = vmem_limit
    cparams = pltpu.CompilerParams(**cp_kwargs)

    if h > w:
        # Pad the width (lane) axis; tile along rows with channels folded in.
        w_out = w + 2 * padding
        rows = c * h
        x2d = image.reshape(rows, w)  # free reshape (contiguous, row-major CHW)
        tile_rows = _choose_row_tile(rows, (w + w_out) * itemsize,
                                     _sublane_align(image.dtype), budget)
        grid = (_cdiv(rows, tile_rows),)
        kernel = functools.partial(_pad_concat_kernel, pad=padding, axis=1, fill=static_fill)
        out2d = pl.pallas_call(
            kernel,
            out_shape=jax.ShapeDtypeStruct((rows, w_out), image.dtype),
            grid=grid,
            in_specs=[pl.BlockSpec((tile_rows, w), lambda i: (i, 0))],
            out_specs=pl.BlockSpec((tile_rows, w_out), lambda i: (i, 0)),
            compiler_params=cparams,
        )(x2d)
        return out2d.reshape(c, h, w_out)

    # h < w: pad the height (sublane) axis; tile along 128-aligned column slabs.
    h_out = h + 2 * padding
    tile_w, n_wt = _choose_col_tile(w, c, (h + h_out) * itemsize, budget)
    grid = (c * n_wt,)  # single long parallel axis (megacore-friendly)
    kernel = functools.partial(_pad_concat_kernel, pad=padding, axis=0, fill=static_fill)
    return pl.pallas_call(
        kernel,
        out_shape=jax.ShapeDtypeStruct((c, h_out, w), image.dtype),
        grid=grid,
        in_specs=[pl.BlockSpec((None, h, tile_w),
                               lambda i: (i // n_wt, 0, i % n_wt))],
        out_specs=pl.BlockSpec((None, h_out, tile_w),
                               lambda i: (i // n_wt, 0, i % n_wt)),
        compiler_params=cparams,
    )(image)


if __name__ == "__main__":
    key = jax.random.PRNGKey(0)
    k1, k2, k3, k4, k5 = jax.random.split(key, 5)

    # Case 1 (Pallas, forced): h > w -> pad width symmetrically.
    img_tall = jax.random.normal(k1, (3, 16, 8), dtype=jnp.float32)
    out_tall = jax.block_until_ready(pad_to_square(img_tall, force_pallas=True))
    assert out_tall.shape == (3, 16, 16), out_tall.shape
    assert jnp.allclose(out_tall, _reference_pad_to_square(img_tall)), "tall case mismatch"

    # Case 2 (Pallas, forced): h < w -> pad height symmetrically.
    img_wide = jax.random.normal(k2, (3, 8, 16), dtype=jnp.float32)
    out_wide = jax.block_until_ready(pad_to_square(img_wide, force_pallas=True))
    assert out_wide.shape == (3, 16, 16), out_wide.shape
    assert jnp.allclose(out_wide, _reference_pad_to_square(img_wide)), "wide case mismatch"

    # Case 3: h == w -> identity (returned as-is, matching the module).
    img_sq = jax.random.normal(k3, (3, 16, 16), dtype=jnp.float32)
    out_sq = jax.block_until_ready(pad_to_square(img_sq))
    assert out_sq.shape == (3, 16, 16)
    assert jnp.allclose(out_sq, img_sq), "square case mismatch"

    # Case 4 (Pallas, forced): odd |h-w| -> padding=(|h-w|)//2 per side; output
    # is NOT square, exactly matching the torch module's behaviour.
    img_odd = jax.random.normal(k4, (3, 16, 9), dtype=jnp.float32)
    out_odd = jax.block_until_ready(pad_to_square(img_odd, force_pallas=True))
    assert out_odd.shape == (3, 16, 15), out_odd.shape
    assert jnp.allclose(out_odd, _reference_pad_to_square(img_odd)), "odd case mismatch"

    # Case 5 (Pallas, forced): non-default fill + uint8 (dtype-aware sublane align).
    img_fill = jax.random.randint(k5, (3, 40, 24), 0, 255, dtype=jnp.uint8)
    out_fill = jax.block_until_ready(pad_to_square(img_fill, fill=7, force_pallas=True))
    assert out_fill.shape == (3, 40, 40)
    assert jnp.array_equal(out_fill, _reference_pad_to_square(img_fill, fill=7)), "fill mismatch"

    # Case 6 (default heuristic -> Pallas path, min-grid + megacore-even tiling).
    img_med = jax.random.normal(k1, (3, 256, 384), dtype=jnp.float32)
    out_med = jax.block_until_ready(pad_to_square(img_med))
    assert out_med.shape == (3, 384, 384), out_med.shape
    assert jnp.allclose(out_med, _reference_pad_to_square(img_med)), "medium wide case mismatch"

    img_med_t = jax.random.normal(k2, (3, 384, 256), dtype=jnp.float32)
    out_med_t = jax.block_until_ready(pad_to_square(img_med_t))
    assert out_med_t.shape == (3, 384, 384), out_med_t.shape
    assert jnp.allclose(out_med_t, _reference_pad_to_square(img_med_t)), "medium tall case mismatch"

    # Case 7 (default heuristic -> jnp.pad fast path for tiny images).
    out_small = jax.block_until_ready(pad_to_square(img_tall))
    assert jnp.allclose(out_small, _reference_pad_to_square(img_tall)), "small fast-path mismatch"

    print("KERNEL_OK")
</pallas_src>

<mosaic_0001>
module attributes {stable_mosaic.version = 11 : i64} {
  func.func @_pad_concat_kernel(%arg0: i32, %arg1: memref<8x8xf32, #tpu.memory_space<vmem>>, %arg2: memref<8x16xf32, #tpu.memory_space<vmem>>) attributes {dimension_semantics = [#tpu.dimension_semantics<parallel>], iteration_bounds = array<i64: 6>, scalar_prefetch = 0 : i64, scratch_operands = 0 : i64, tpu.core_type = #tpu.core_type<tc>, window_params = [{transform_indices = @transform_0, window_bounds = array<i64: 8, 8>}, {transform_indices = @transform_1, window_bounds = array<i64: 8, 16>}]} {
    %c0 = arith.constant 0 : index
    %c0_0 = arith.constant 0 : index
    %0 = vector.load %arg1[%c0, %c0_0] : memref<8x8xf32, #tpu.memory_space<vmem>>, vector<8x8xf32>
    %cst = arith.constant 0.000000e+00 : f32
    %1 = vector.broadcast %cst : f32 to vector<8x4xf32>
    %2 = tpu.concatenate %1, %0, %1 in 1 : vector<8x4xf32>, vector<8x8xf32>, vector<8x4xf32> -> vector<8x16xf32>
    %c0_1 = arith.constant 0 : index
    %c0_2 = arith.constant 0 : index
    %3 = vector.load %arg2[%c0_1, %c0_2] : memref<8x16xf32, #tpu.memory_space<vmem>>, vector<8x16xf32>
    tpu.vector_store %arg2[%c0_1, %c0_2], %2 {strides = array<i32>} : memref<8x16xf32, #tpu.memory_space<vmem>>, vector<8x16xf32>,
    return
  }
  func.func @transform_0(%arg0: i32) -> (i32, i32) {
    %c0_i32 = arith.constant 0 : i32
    %c0_i32_0 = arith.constant 0 : i32
    return %arg0, %c0_i32 : i32, i32
  }
  func.func @transform_1(%arg0: i32) -> (i32, i32) {
    %c0_i32 = arith.constant 0 : i32
    %c0_i32_0 = arith.constant 0 : i32
    return %arg0, %c0_i32 : i32, i32
  }
}

</mosaic_0001>

<bundles_post_ra>
// kernel: tpu_custom_call.1
= control target key start
LH: loop header
LB: loop body
LE: loop exit
PB: predicated region body
PF: predicated region fallthrough
CT: control target
= control target key end

     0   :  { %s198_s6 = smov 0   ;;  %s219_s0 = inlined_call_operand.vmem [shape: f32[48,8], index: 0, kind: input, shape index: {}]   ;;  %s220_s1 = inlined_call_operand.vmem [shape: f32[48,16], index: 1, kind: output, shape index: {}]  }
   0x1 LB: > { %s176_s7 = sadd.s32 4294967295, %s200_s6   ;;  %p180_p0 = scmp.ge.s32.totalorder %s200_s6, 1  ;;  %s200_s6 = sphi %s198_s6, %s11_s6  }
   0x2   : > { %p86_p1 = scmp.lt.s32.totalorder %s200_s6, 7 }
   0x4   : > { %p87_p2 = pnand %p180_p0, %p86_p1 }
   0x5   : > { %p104_p3 = scmp.lt.s32.totalorder (!%p87_p2), %s176_s7, 5  ;;  %s202_s12 = smov (!%p87_p2), 4   ;;  %vm117_vm0 = vcmask (!%p87_p2), 31744   ;;  %vm119_vm1 = vcmask (!%p87_p2), 97280   ;;  %vm121_vm2 = vcmask (!%p87_p2), 130048  }
   0x6   : > { %90 = sbr.rel (%p87_p2) target bundleno = 135 (0x87), region = 24 }
   0xd   : > { %s222_s7 = smov (!%p104_p3, %s176_s7), 5 }
   0xe   : > { %s181_s8 = sshll.u32 %s222_s7, 3 }
   0xf   : > { %s107_s11 = scalar_lea.vmem %s219_s0, %s181_s8  ;;  %s111_s15 = scalar_lea.vmem %s220_s1, %s181_s8 }
  0x10   : > { %v112_v0 = vld [vmem:[%s107_s11] sm:$0xff] }
  0x11   : > { %114 = vrot.lane.b32.xlu0 %v112_v0, %s202_s12 }
  0x83   : > { %v115_v1 = vpop.permute.xlu0 %114 }
  0x84   : > { %v118_v2 = vsel %vm117_vm0, 0.0, %v115_v1 }
  0x85   : > { %v120_v3 = vsel %vm119_vm1, %v118_v2, 0.0 }
  0x86   : > { %122 = vst.msk [vmem:[%s111_s15] sm:$0xff] %vm121_vm2, %v120_v3 }
  0x87 PF: > { %s11_s6 = sadd.s32 1, %s200_s6  }
  0x88   : > { %p8_p4 = scmp.ge.s32.totalorder %s11_s6, 8  }
  0x8a   :  { %10 = sbr.rel (!%p8_p4) target bundleno = 1 (0x1), region = 54 }

</bundles_post_ra>
